<compile_context>
chip_gen: v6e
topology: v6e:2x2x1
jax: 0.10.0
libtpu: 0.0.40
codegen_flags: <defaults>
</compile_context>

<pallas_src>
import jax
import jax.numpy as jnp
from jax.experimental import pallas as pl
from jax.experimental.pallas import tpu as pltpu


def _round_up(n, m):
    return ((n + m - 1) // m) * m


def duelling_dqn_kernel(x_ref, w1_ref, b1_ref, w2_ref, b2_ref,
                        wq_ref, bq_ref, q_ref):
    # in_layer + ReLU (bf16 MXU inputs, f32 accumulation); x cast in-kernel.
    x = x_ref[...].astype(w1_ref.dtype)
    h = jnp.dot(x, w1_ref[...], preferred_element_type=jnp.float32)
    h = jnp.maximum(h + b1_ref[...], 0.0)

    # hidden layer + ReLU
    h = jnp.dot(h.astype(w2_ref.dtype), w2_ref[...],
                preferred_element_type=jnp.float32)
    h = jnp.maximum(h + b2_ref[...], 0.0)

    # Fused, pre-combined dueling head: q = h @ W_q + b_q.
    # Columns [out_dim, 128) of W_q / b_q are zero, so those output lanes
    # are exact zeros.  One unmasked lane-dense store (bf16 output).
    q = jnp.dot(h.astype(wq_ref.dtype), wq_ref[...],
                preferred_element_type=jnp.float32) + bq_ref[...]
    q_ref[...] = q.astype(q_ref.dtype)


def prepare_params(params, compute_dtype=jnp.bfloat16, lane=128):
    """Cast weights to bf16 and fold the dueling combine into a fused head.

    q[:, j] = a_j + v - mean_k(a_k)
            = h @ (Wa[:, j] + wv - mean_k Wa[:, k]) + (ba_j + bv - mean_k ba_k)
    """
    (w1, b1, w2, b2, wv, bv, wa, ba) = params
    h1, out_dim = wa.shape
    head_width = _round_up(max(out_dim, lane), lane)   # lane-dense, >= 128

    wa_mean = jnp.mean(wa, axis=1, keepdims=True)      # (h1, 1)
    ba_mean = jnp.mean(ba, axis=1, keepdims=True)      # (1, 1)
    wq_true = wa + wv - wa_mean                        # (h1, out_dim)
    bq_true = ba + bv - ba_mean                        # (1, out_dim)

    wq = jnp.zeros((h1, head_width), jnp.float32).at[:, :out_dim].set(wq_true)
    bq = jnp.zeros((1, head_width), jnp.float32).at[:, :out_dim].set(bq_true)

    return (w1.astype(compute_dtype), b1.astype(jnp.float32),
            w2.astype(compute_dtype), b2.astype(jnp.float32),
            wq.astype(compute_dtype), bq.astype(jnp.float32),
            out_dim)


def duelling_dqn_forward(x, prepared, *, block_batch=1024,
                         out_dtype=jnp.bfloat16):
    w1, b1, w2, b2, wq, bq, out_dim = prepared
    batch, input_dim = x.shape
    head_width = wq.shape[1]

    # Batch tiling: 16-row multiples (bf16 sublane packing); prefer >= 2
    # grid steps so both v7x TensorCores get work when there is enough batch.
    MIN_TILE = 16
    batch16 = _round_up(batch, MIN_TILE)
    tb = min(block_batch, batch16)
    if batch16 >= 2 * MIN_TILE and batch16 // tb < 2:
        tb = max(MIN_TILE, _round_up((batch16 + 1) // 2, MIN_TILE))
    batch_pad = _round_up(batch, tb)
    if batch_pad != batch:
        x = jnp.pad(x, ((0, batch_pad - batch), (0, 0)))

    grid = (batch_pad // tb,)

    # Weights/biases: same block every grid step -> stay VMEM-resident.
    resident = lambda arr: pl.BlockSpec(arr.shape, lambda i: (0, 0))

    flops = 2 * batch_pad * (input_dim * w1.shape[1]
                             + w1.shape[1] * w2.shape[1]
                             + w2.shape[1] * head_width)
    bytes_accessed = sum(int(a.size) * a.dtype.itemsize
                         for a in (x, w1, b1, w2, b2, wq, bq))
    bytes_accessed += batch_pad * head_width * jnp.dtype(out_dtype).itemsize

    q_pad = pl.pallas_call(
        duelling_dqn_kernel,
        out_shape=jax.ShapeDtypeStruct((batch_pad, head_width), out_dtype),
        grid=grid,
        in_specs=[pl.BlockSpec((tb, input_dim), lambda i: (i, 0)),
                  resident(w1), resident(b1),
                  resident(w2), resident(b2),
                  resident(wq), resident(bq)],
        out_specs=pl.BlockSpec((tb, head_width), lambda i: (i, 0)),
        compiler_params=pltpu.CompilerParams(
            dimension_semantics=("parallel",)),
        cost_estimate=pl.CostEstimate(flops=flops, transcendentals=0,
                                      bytes_accessed=bytes_accessed),
    )(x, w1, b1, w2, b2, wq, bq)

    # Columns [out_dim, head_width) are exact zeros; consumers that can use
    # the padded slab directly should do so and skip this slice.
    return q_pad[:batch, :out_dim]


def init_params(key, input_dim, output_dim, hidden_dim=(512, 256)):
    """Deterministic init mimicking nn.Linear's uniform(-1/sqrt(fan_in), ...)."""
    dims = [(input_dim, hidden_dim[0]),
            (hidden_dim[0], hidden_dim[1]),
            (hidden_dim[1], 1),            # value head
            (hidden_dim[1], output_dim)]   # advantage head
    params = []
    for (fan_in, fan_out) in dims:
        key, kw, kb = jax.random.split(key, 3)
        bound = 1.0 / (fan_in ** 0.5)
        w = jax.random.uniform(kw, (fan_in, fan_out), jnp.float32, -bound, bound)
        b = jax.random.uniform(kb, (1, fan_out), jnp.float32, -bound, bound)
        params.append((w, b))
    (w1, b1), (w2, b2), (wv, bv), (wa, ba) = params
    return (w1, b1, w2, b2, wv, bv, wa, ba)


def reference_forward(x, params):
    """Pure-JAX f32 reference mirroring the PyTorch forward exactly."""
    (w1, b1, w2, b2, wv, bv, wa, ba) = params
    h = jnp.maximum(jnp.dot(x, w1) + b1, 0.0)
    h = jnp.maximum(jnp.dot(h, w2) + b2, 0.0)
    a = jnp.dot(h, wa) + ba
    v = jnp.dot(h, wv) + bv
    return v + a - jnp.mean(a, axis=1, keepdims=True)


def reference_from_prepared(x, prepared, out_dtype=jnp.bfloat16):
    """Pure-JAX reference using the SAME quantized/fused params as the kernel."""
    w1, b1, w2, b2, wq, bq, out_dim = prepared
    xb = x.astype(w1.dtype)
    h = jnp.maximum(jnp.dot(xb, w1, preferred_element_type=jnp.float32) + b1, 0.0)
    h = jnp.maximum(jnp.dot(h.astype(w2.dtype), w2,
                            preferred_element_type=jnp.float32) + b2, 0.0)
    q = jnp.dot(h.astype(wq.dtype), wq,
                preferred_element_type=jnp.float32) + bq
    return q[:, :out_dim].astype(out_dtype)


if __name__ == "__main__":
    input_dim, output_dim = 32, 8
    hidden_dim = (512, 256)

    key = jax.random.PRNGKey(0)
    kp, kx1, kx2 = jax.random.split(key, 3)
    params = init_params(kp, input_dim, output_dim, hidden_dim)
    prepared = prepare_params(params)

    ok = True
    # batch=8: single-step grid (inference path); batch=33: 2-step parallel grid.
    for kx, batch in ((kx1, 8), (kx2, 33)):
        x = jax.random.normal(kx, (batch, input_dim), jnp.float32)

        q = duelling_dqn_forward(x, prepared)
        q = jax.block_until_ready(q)
        assert q.shape == (batch, output_dim)

        # Tight check vs a reference using the SAME bf16 params / fused head.
        q_ref_q = reference_from_prepared(x, prepared)
        ok &= bool(jnp.allclose(q.astype(jnp.float32),
                                q_ref_q.astype(jnp.float32),
                                atol=2e-2, rtol=2e-2))

        # Loose sanity check vs the full-f32 PyTorch-equivalent reference
        # (bf16 weight storage / bf16 output cannot bit-match f32).
        q_ref_f32 = reference_forward(x, params)
        ok &= bool(jnp.allclose(q.astype(jnp.float32), q_ref_f32,
                                atol=1e-1, rtol=1e-1))

    assert ok, "kernel output mismatch vs references"
    print("KERNEL_OK")
</pallas_src>

<mosaic_0001>
module attributes {stable_mosaic.version = 11 : i64} {
  func.func @duelling_dqn_kernel(%arg0: i32, %arg1: memref<16x32xf32, #tpu.memory_space<vmem>>, %arg2: memref<32x512xbf16, #tpu.memory_space<vmem>>, %arg3: memref<1x512xf32, #tpu.memory_space<vmem>>, %arg4: memref<512x256xbf16, #tpu.memory_space<vmem>>, %arg5: memref<1x256xf32, #tpu.memory_space<vmem>>, %arg6: memref<256x128xbf16, #tpu.memory_space<vmem>>, %arg7: memref<1x128xf32, #tpu.memory_space<vmem>>, %arg8: memref<16x128xbf16, #tpu.memory_space<vmem>>) attributes {dimension_semantics = [#tpu.dimension_semantics<parallel>], iteration_bounds = array<i64: 1>, scalar_prefetch = 0 : i64, scratch_operands = 0 : i64, tpu.core_type = #tpu.core_type<tc>, window_params = [{transform_indices = @transform_0, window_bounds = array<i64: 16, 32>}, {pipeline_mode = #tpu.pipeline_mode<synchronous>, transform_indices = @transform_1, window_bounds = array<i64: 32, 512>}, {pipeline_mode = #tpu.pipeline_mode<synchronous>, transform_indices = @transform_2, window_bounds = array<i64: 1, 512>}, {pipeline_mode = #tpu.pipeline_mode<synchronous>, transform_indices = @transform_3, window_bounds = array<i64: 512, 256>}, {pipeline_mode = #tpu.pipeline_mode<synchronous>, transform_indices = @transform_4, window_bounds = array<i64: 1, 256>}, {pipeline_mode = #tpu.pipeline_mode<synchronous>, transform_indices = @transform_5, window_bounds = array<i64: 256, 128>}, {pipeline_mode = #tpu.pipeline_mode<synchronous>, transform_indices = @transform_6, window_bounds = array<i64: 1, 128>}, {transform_indices = @transform_7, window_bounds = array<i64: 16, 128>}]} {
    %c0 = arith.constant 0 : index
    %c0_0 = arith.constant 0 : index
    %0 = vector.load %arg1[%c0, %c0_0] : memref<16x32xf32, #tpu.memory_space<vmem>>, vector<16x32xf32>
    %1 = arith.truncf %0 : vector<16x32xf32> to vector<16x32xbf16>
    %c0_1 = arith.constant 0 : index
    %c0_2 = arith.constant 0 : index
    %2 = vector.load %arg2[%c0_1, %c0_2] : memref<32x512xbf16, #tpu.memory_space<vmem>>, vector<32x512xbf16>
    %cst = arith.constant dense<0.000000e+00> : vector<16x512xf32>
    %3 = tpu.matmul %1, %2, %cst {dimension_numbers = #tpu.dot_dimension_numbers<[1], [0], [0], [1], [0, 0, 1, 1], [], []>} : vector<16x32xbf16>, vector<32x512xbf16>, vector<16x512xf32> -> vector<16x512xf32>
    %c0_3 = arith.constant 0 : index
    %c0_4 = arith.constant 0 : index
    %4 = vector.load %arg3[%c0_3, %c0_4] : memref<1x512xf32, #tpu.memory_space<vmem>>, vector<1x512xf32>
    %5 = vector.broadcast %4 : vector<1x512xf32> to vector<16x512xf32>
    %6 = arith.addf %3, %5 : vector<16x512xf32>
    %cst_5 = arith.constant 0.000000e+00 : f32
    %7 = vector.broadcast %cst_5 : f32 to vector<16x512xf32>
    %8 = arith.maximumf %6, %7 : vector<16x512xf32>
    %9 = arith.truncf %8 : vector<16x512xf32> to vector<16x512xbf16>
    %c0_6 = arith.constant 0 : index
    %c0_7 = arith.constant 0 : index
    %10 = vector.load %arg4[%c0_6, %c0_7] : memref<512x256xbf16, #tpu.memory_space<vmem>>, vector<512x256xbf16>
    %cst_8 = arith.constant dense<0.000000e+00> : vector<16x256xf32>
    %11 = tpu.matmul %9, %10, %cst_8 {dimension_numbers = #tpu.dot_dimension_numbers<[1], [0], [0], [1], [0, 0, 1, 1], [], []>} : vector<16x512xbf16>, vector<512x256xbf16>, vector<16x256xf32> -> vector<16x256xf32>
    %c0_9 = arith.constant 0 : index
    %c0_10 = arith.constant 0 : index
    %12 = vector.load %arg5[%c0_9, %c0_10] : memref<1x256xf32, #tpu.memory_space<vmem>>, vector<1x256xf32>
    %13 = vector.broadcast %12 : vector<1x256xf32> to vector<16x256xf32>
    %14 = arith.addf %11, %13 : vector<16x256xf32>
    %cst_11 = arith.constant 0.000000e+00 : f32
    %15 = vector.broadcast %cst_11 : f32 to vector<16x256xf32>
    %16 = arith.maximumf %14, %15 : vector<16x256xf32>
    %17 = arith.truncf %16 : vector<16x256xf32> to vector<16x256xbf16>
    %c0_12 = arith.constant 0 : index
    %c0_13 = arith.constant 0 : index
    %18 = vector.load %arg6[%c0_12, %c0_13] : memref<256x128xbf16, #tpu.memory_space<vmem>>, vector<256x128xbf16>
    %cst_14 = arith.constant dense<0.000000e+00> : vector<16x128xf32>
    %19 = tpu.matmul %17, %18, %cst_14 {dimension_numbers = #tpu.dot_dimension_numbers<[1], [0], [0], [1], [0, 0, 1, 1], [], []>} : vector<16x256xbf16>, vector<256x128xbf16>, vector<16x128xf32> -> vector<16x128xf32>
    %c0_15 = arith.constant 0 : index
    %c0_16 = arith.constant 0 : index
    %20 = vector.load %arg7[%c0_15, %c0_16] : memref<1x128xf32, #tpu.memory_space<vmem>>, vector<1x128xf32>
    %21 = vector.broadcast %20 : vector<1x128xf32> to vector<16x128xf32>
    %22 = arith.addf %19, %21 : vector<16x128xf32>
    %23 = arith.truncf %22 : vector<16x128xf32> to vector<16x128xbf16>
    %c0_17 = arith.constant 0 : index
    %c0_18 = arith.constant 0 : index
    %24 = vector.load %arg8[%c0_17, %c0_18] : memref<16x128xbf16, #tpu.memory_space<vmem>>, vector<16x128xbf16>
    tpu.vector_store %arg8[%c0_17, %c0_18], %23 {strides = array<i32>} : memref<16x128xbf16, #tpu.memory_space<vmem>>, vector<16x128xbf16>,
    return
  }
  func.func @transform_0(%arg0: i32) -> (i32, i32) {
    %c0_i32 = arith.constant 0 : i32
    %c0_i32_0 = arith.constant 0 : i32
    return %arg0, %c0_i32 : i32, i32
  }
  func.func @transform_1(%arg0: i32) -> (i32, i32) {
    %c0_i32 = arith.constant 0 : i32
    %c0_i32_0 = arith.constant 0 : i32
    %c0_i32_1 = arith.constant 0 : i32
    return %c0_i32, %c0_i32_0 : i32, i32
  }
  func.func @transform_2(%arg0: i32) -> (i32, i32) {
    %c0_i32 = arith.constant 0 : i32
    %c0_i32_0 = arith.constant 0 : i32
    %c0_i32_1 = arith.constant 0 : i32
    return %c0_i32, %c0_i32_0 : i32, i32
  }
  func.func @transform_3(%arg0: i32) -> (i32, i32) {
    %c0_i32 = arith.constant 0 : i32
    %c0_i32_0 = arith.constant 0 : i32
    %c0_i32_1 = arith.constant 0 : i32
    return %c0_i32, %c0_i32_0 : i32, i32
  }
  func.func @transform_4(%arg0: i32) -> (i32, i32) {
    %c0_i32 = arith.constant 0 : i32
    %c0_i32_0 = arith.constant 0 : i32
    %c0_i32_1 = arith.constant 0 : i32
    return %c0_i32, %c0_i32_0 : i32, i32
  }
  func.func @transform_5(%arg0: i32) -> (i32, i32) {
    %c0_i32 = arith.constant 0 : i32
    %c0_i32_0 = arith.constant 0 : i32
    %c0_i32_1 = arith.constant 0 : i32
    return %c0_i32, %c0_i32_0 : i32, i32
  }
  func.func @transform_6(%arg0: i32) -> (i32, i32) {
    %c0_i32 = arith.constant 0 : i32
    %c0_i32_0 = arith.constant 0 : i32
    %c0_i32_1 = arith.constant 0 : i32
    return %c0_i32, %c0_i32_0 : i32, i32
  }
  func.func @transform_7(%arg0: i32) -> (i32, i32) {
    %c0_i32 = arith.constant 0 : i32
    %c0_i32_0 = arith.constant 0 : i32
    return %arg0, %c0_i32 : i32, i32
  }
}

</mosaic_0001>

<bundles_post_ra>
// kernel: tpu_custom_call.1
= control target key start
LH: loop header
LB: loop body
LE: loop exit
PB: predicated region body
PF: predicated region fallthrough
CT: control target
= control target key end

     0   :  { %12 = vsyncpa [#allocation3], 0  ;;  %s1448_s0 = inlined_call_operand.hbm [shape: f32[16,32], index: 0, kind: input, shape index: {}]   ;;  %s1449_s1 = inlined_call_operand.hbm [shape: bf16[32,512], index: 1, kind: input, shape index: {}]   ;;  %s1450_s2 = inlined_call_operand.hbm [shape: f32[1,512], index: 2, kind: input, shape index: {}]   ;;  %s1451_s3 = inlined_call_operand.hbm [shape: bf16[512,256], index: 3, kind: input, shape index: {}]   ;;  %s1452_s4 = inlined_call_operand.vmem [shape: f32[1,256], index: 4, kind: input, shape index: {}]   ;;  %s1453_s5 = inlined_call_operand.hbm [shape: bf16[256,128], index: 5, kind: input, shape index: {}]   ;;  %s1454_s6 = inlined_call_operand.vmem [shape: f32[1,128], index: 6, kind: input, shape index: {}]   ;;  %s1455_s7 = inlined_call_operand.hbm [shape: bf16[16,128], index: 7, kind: output, shape index: {}]  }
   0x1   :  { %13 = vsyncpa [#allocation6], 0 }
   0x2   :  { %14 = vsyncpa [#allocation9], 0 }
   0x3   :  { %15 = vsyncpa [#allocation4], 0  ;;  %s1349_s24 = smov [#allocation5]  }
   0x4   :  { %s33_s25 = sshll.u32 %s1349_s24, 4  ;;  %s34_s25 = int_to_ptr.vmem [resolvable:$true] %s33_s25 }
   0x5   :  { %s1229_s26 = scalar_lea.vmem %s34_s25, 1024  ;;  %p1234_p1 = scmp.lt.s32.totalorder %s34_s25, %s34_s25 }
   0x6   :  { %p1230_p0 = scmp.ne.s32.totalorder %s34_s25, %s1229_s26  ;;  %p1235_p2 = scmp.lt.s32.totalorder %s1229_s26, %s1229_s26 }
   0x8   :  { %p1236_p3 = por %p1235_p2, %p1234_p1 }
   0xa   :  { %p1237_p4 = pnand %p1236_p3, %p1230_p0 }
   0xc   :  { %1240 = shalt.err (!%p1237_p4)
}
   0xd   :  { %s1350_s27 = smov 256   ;;  %s1351_s28 = smov 16  }
   0xe   :  { %39 = dma.hbm_to_vmem [thread:$0]  %s1449_s1, 1024, %s34_s25, [#allocation6], %s1350_s27, %s1350_s27, %s1351_s28  }
   0xf   :  { %s1352_s8 = smov [#allocation8]   ;;  %s1353_s10 = smov [#allocation2]  }
  0x10   :  { %s55_s9 = sshll.u32 %s1352_s8, 4  ;;  %s21_s11 = sshll.u32 %s1353_s10, 4  ;;  %s56_s9 = int_to_ptr.vmem [resolvable:$true] %s55_s9  ;;  %s22_s11 = int_to_ptr.vmem [resolvable:$true] %s21_s11 }
  0x11   :  { %s1249_s12 = scalar_lea.vmem %s56_s9, 8192  ;;  %p1254_p6 = scmp.lt.s32.totalorder %s56_s9, %s56_s9 }
  0x12   :  { %p1250_p5 = scmp.ne.s32.totalorder %s56_s9, %s1249_s12  ;;  %p1255_p7 = scmp.lt.s32.totalorder %s1249_s12, %s1249_s12 }
  0x14   :  { %p1256_p8 = por %p1255_p7, %p1254_p6 }
  0x16   :  { %p1257_p9 = pnand %p1256_p8, %p1250_p5 }
  0x18   :  { %1260 = shalt.err (!%p1257_p9)
}
  0x19   :  { %s1354_s13 = smov 128   ;;  %s1355_s14 = smov 8  }
  0x1a   :  { %61 = dma.hbm_to_vmem [thread:$0]  %s1451_s3, 8192, %s56_s9, [#allocation9], %s1354_s13, %s1354_s13, %s1355_s14  }
  0x1b   :  { %s1269_s1 = scalar_lea.vmem %s22_s11, 256  ;;  %p1274_p11 = scmp.lt.s32.totalorder %s22_s11, %s22_s11 }
  0x1c   :  { %p1270_p10 = scmp.ne.s32.totalorder %s22_s11, %s1269_s1  ;;  %p1275_p12 = scmp.lt.s32.totalorder %s1269_s1, %s1269_s1 }
  0x1e   :  { %p1276_p13 = por %p1275_p12, %p1274_p11 }
  0x20   :  { %p1277_p0 = pnand %p1276_p13, %p1270_p10 }
  0x22   :  { %1280 = shalt.err (!%p1277_p0)
}
  0x23   :  { %27 = dma.hbm_to_vmem [thread:$0]  %s1448_s0, 256, %s22_s11, [#allocation3], %s1354_s13, %s1354_s13, %s1355_s14  }
  0x24   :  { %s1356_s19 = smov [#allocation7]   ;;  %s1357_s21 = smov [#allocation10]  }
  0x25   :  { %s46_s20 = sshll.u32 %s1356_s19, 4  ;;  %s69_s22 = sshll.u32 %s1357_s21, 4  ;;  %s47_s20 = int_to_ptr.vmem [resolvable:$true] %s46_s20  ;;  %s70_s22 = int_to_ptr.vmem [resolvable:$true] %s69_s22 }
  0x26   :  { %s1289_s23 = scalar_lea.vmem %s47_s20, 64  ;;  %p1294_p2 = scmp.lt.s32.totalorder %s47_s20, %s47_s20 }
  0x27   :  { %p1290_p1 = scmp.ne.s32.totalorder %s47_s20, %s1289_s23  ;;  %p1295_p3 = scmp.lt.s32.totalorder %s1289_s23, %s1289_s23 }
  0x29   :  { %p1296_p4 = por %p1295_p3, %p1294_p2 }
  0x2b   :  { %p1297_p5 = pnand %p1296_p4, %p1290_p1 }
  0x2d   :  { %1300 = shalt.err (!%p1297_p5)
}
  0x2e   :  { %49 = dma.hbm_to_vmem [thread:$0]  %s1450_s2, 64, %s47_s20, [#allocation6]  }
  0x2f   :  { %s1309_s25 = scalar_lea.vmem %s70_s22, 2048  ;;  %p1314_p7 = scmp.lt.s32.totalorder %s70_s22, %s70_s22 }
  0x30   :  { %p1310_p6 = scmp.ne.s32.totalorder %s70_s22, %s1309_s25  ;;  %p1315_p8 = scmp.lt.s32.totalorder %s1309_s25, %s1309_s25 }
  0x32   :  { %p1316_p9 = por %p1315_p8, %p1314_p7 }
  0x34   :  { %p1317_p10 = pnand %p1316_p9, %p1310_p6 }
  0x36   :  { %1320 = shalt.err (!%p1317_p10)
}
  0x37   :  { %s1358_s0 = smov 64   ;;  %s1359_s26 = smov 4  }
  0x38   :  { %75 = dma.hbm_to_vmem [thread:$0]  %s1453_s5, 2048, %s70_s22, [#allocation9], %s1358_s0, %s1358_s0, %s1359_s26  }
  0x39   :  { %1341 = dma.done.wait [#allocation3], 256  }
  0x3a   :  { %1342 = vsyncadd [#allocation3], 4294967040 }
  0x3b   :  { %1343 = dma.done.wait [#allocation6], 1088  }
  0x3c   :  { %1344 = vsyncadd [#allocation6], 4294966208 }
  0x3d   :  { %1345 = dma.done.wait [#allocation9], 10240  }
  0x3e   :  { %1346 = vsyncadd [#allocation9], 4294957056  ;;  %v1360_v0 = vmov 0   ;;  %v1097_v1 = vld [vmem:[#allocation5 + $0x24] ss:$16 sps:$4 sm:$0xff]   ;;  %v95_v6 = vld [vmem:[#allocation2 + $0x8] sm:$0xff] }
  0x3f   :  { %203 = vmatprep.mubr.bf16.mxu1 %v1360_v0  ;;  %v1099_v2 = vld [vmem:[#allocation5 + $0x20] ss:$16 sps:$4 sm:$0xff]   ;;  %183 = vmatprep.subr.bf16.mxu1 %v1097_v1  ;;  %v1100_v3 = vld [vmem:[#allocation5 + $0x4] ss:$16 sps:$4 sm:$0xff]   ;;  %v1105_v7 = vld [vmem:[#allocation5 + $0x2c] ss:$16 sps:$4 sm:$0xff]  }
  0x40   :  { %v1102_v4 = vld [vmem:[#allocation5] ss:$16 sps:$4 sm:$0xff]   ;;  %184 = vmatpush1.bf16.msra.mxu1 %v1099_v2  ;;  %v1103_v8 = vld [vmem:[#allocation5 + $0x28] ss:$16 sps:$4 sm:$0xff]   ;;  %vm167_vm0 = vcmask 261120   ;;  %s1361_s30 = smov [#allocation11]  }
  0x41   :  { %v94_v5 = vld [vmem:[#allocation2] sm:$0xff]  ;;  %185 = vmatprep.subr.bf16.mxu1 %v1100_v3  ;;  %v1109_v10 = vld [vmem:[#allocation8 + $0x74] ss:$8 sps:$4 sm:$0xff]   ;;  %v1108_v12 = vld [vmem:[#allocation5 + $0xc] ss:$16 sps:$4 sm:$0xff]   ;;  %s948_s8 = sshll.u32 %s1361_s30, 4  ;;  %s949_s8 = int_to_ptr.vmem [resolvable:$true] %s948_s8 }
  0x42   :  { %v96_v9 = vpack.c.bf16 %v95_v6, %v94_v5  ;;  %v1111_v11 = vld [vmem:[#allocation8 + $0x70] ss:$8 sps:$4 sm:$0xff]   ;;  %665 = vmatprep.subr.bf16.mxu0 %v1109_v10  ;;  %v1112_v13 = vld [vmem:[#allocation8 + $0x64] ss:$8 sps:$4 sm:$0xff]   ;;  %v1114_v14 = vld [vmem:[#allocation8 + $0x60] ss:$8 sps:$4 sm:$0xff]   ;;  %p1326_p12 = scmp.lt.s32.totalorder %s949_s8, %s949_s8 }
  0x43   :  { %666 = vmatpush1.bf16.msra.mxu0 %v1111_v11  ;;  %v1115_v15 = vld [vmem:[#allocation8 + $0x54] ss:$8 sps:$4 sm:$0xff]   ;;  %v1120_v18 = vld [vmem:[#allocation8 + $0x50] ss:$8 sps:$4 sm:$0xff]   ;;  %v1121_v19 = vld [vmem:[#allocation8 + $0x44] ss:$8 sps:$4 sm:$0xff]  }
  0x44   :  { %186 = vmatpush1.bf16.msra.mxu1 %v1102_v4  ;;  %667 = vmatprep.subr.bf16.mxu0 %v1112_v13  ;;  %v1106_v16 = vld [vmem:[#allocation5 + $0x8] ss:$16 sps:$4 sm:$0xff]   ;;  %v1117_v20 = vld [vmem:[#allocation8 + $0x170] ss:$8 sps:$4 sm:$0xff]   ;;  %v1126_v22 = vld [vmem:[#allocation8 + $0x40] ss:$8 sps:$4 sm:$0xff]   ;;  %v107_v13 = vlaneseq }
  0x45   :  { %226 = vmatprep.subr.bf16.mxu1 %v1105_v7  ;;  %v1119_v17 = vld [vmem:[#allocation8 + $0x174] ss:$8 sps:$4 sm:$0xff]   ;;  %v1125_v21 = vld [vmem:[#allocation8 + $0x164] ss:$8 sps:$4 sm:$0xff]   ;;  %v1123_v24 = vld [vmem:[#allocation8 + $0x160] ss:$8 sps:$4 sm:$0xff]  }
  0x46   :  { %v1127_v23 = vld [vmem:[#allocation8 + $0x34] ss:$8 sps:$4 sm:$0xff]   ;;  %v1132_v26 = vld [vmem:[#allocation8 + $0x30] ss:$8 sps:$4 sm:$0xff]   ;;  %v1133_v27 = vld [vmem:[#allocation8 + $0x24] ss:$8 sps:$4 sm:$0xff]  }
  0x47   :  { %970 = vmatmul.mubr.msk.bf16.vlgmr.msra.gmra.mxu1 %vm167_vm0, %v96_v9  ;;  %668 = vmatpush1.bf16.msra.mxu0 %v1114_v14  ;;  %v1131_v25 = vld [vmem:[#allocation8 + $0x154] ss:$8 sps:$4 sm:$0xff]   ;;  %v1129_v28 = vld [vmem:[#allocation8 + $0x150] ss:$8 sps:$4 sm:$0xff]   ;;  %v1137_v29 = vld [vmem:[#allocation8 + $0x144] ss:$8 sps:$4 sm:$0xff]  }
  0x48   :  { %227 = vmatpush1.bf16.msra.mxu1 %v1103_v8  ;;  %246 = vmatprep.mubr.bf16.mxu1 %v1360_v0  ;;  %v1138_v30 = vld [vmem:[#allocation8 + $0x20] ss:$8 sps:$4 sm:$0xff]   ;;  %v1139_v31 = vld [vmem:[#allocation8 + $0x14] ss:$8 sps:$4 sm:$0xff]   ;;  %v1144_v34 = vld [vmem:[#allocation8 + $0x10] ss:$8 sps:$4 sm:$0xff]  }
  0x49   :  { %228 = vmatprep.subr.bf16.mxu1 %v1108_v12  ;;  %669 = vmatprep.subr.bf16.mxu0 %v1115_v15  ;;  %v1135_v32 = vld [vmem:[#allocation8 + $0x140] ss:$8 sps:$4 sm:$0xff]   ;;  %v1143_v33 = vld [vmem:[#allocation8 + $0x134] ss:$8 sps:$4 sm:$0xff]   ;;  %v1145_v35 = vld [vmem:[#allocation8 + $0x4] ss:$8 sps:$4 sm:$0xff]  }
  0x4a   :  { %v1141_v36 = vld [vmem:[#allocation8 + $0x130] ss:$8 sps:$4 sm:$0xff]   ;;  %v1149_v37 = vld [vmem:[#allocation8 + $0x124] ss:$8 sps:$4 sm:$0xff]   ;;  %v1150_v38 = vld [vmem:[#allocation8] ss:$8 sps:$4 sm:$0xff]  }
  0x4b   :  { %670 = vmatpush1.bf16.msra.mxu0 %v1120_v18  ;;  %v1151_v39 = vld [vmem:[#allocation8 + $0xf4] ss:$8 sps:$4 sm:$0xff]   ;;  %v1147_v40 = vld [vmem:[#allocation8 + $0x120] ss:$8 sps:$4 sm:$0xff]   ;;  %v1153_v42 = vld [vmem:[#allocation8 + $0x110] ss:$8 sps:$4 sm:$0xff]  }
  0x4c   :  { %229 = vmatpush1.bf16.msra.mxu1 %v1106_v16  ;;  %671 = vmatprep.subr.bf16.mxu0 %v1121_v19  ;;  %v1155_v41 = vld [vmem:[#allocation8 + $0x114] ss:$8 sps:$4 sm:$0xff]   ;;  %v1156_v43 = vld [vmem:[#allocation8 + $0xf0] ss:$8 sps:$4 sm:$0xff]   ;;  %v1157_v44 = vld [vmem:[#allocation8 + $0xe4] ss:$8 sps:$4 sm:$0xff]  }
  0x4d   :  { %708 = vmatprep.subr.bf16.mxu1 %v1119_v17  ;;  %v1161_v45 = vld [vmem:[#allocation8 + $0x104] ss:$8 sps:$4 sm:$0xff]   ;;  %v1162_v46 = vld [vmem:[#allocation8 + $0xe0] ss:$8 sps:$4 sm:$0xff]   ;;  %v1163_v47 = vld [vmem:[#allocation8 + $0xd4] ss:$8 sps:$4 sm:$0xff]  }
  0x4e   :  { %v1159_v48 = vld [vmem:[#allocation8 + $0x100] ss:$8 sps:$4 sm:$0xff]   ;;  %v1167_v49 = vld [vmem:[#allocation8 + $0x1f4] ss:$8 sps:$4 sm:$0xff]   ;;  %v1168_v50 = vld [vmem:[#allocation8 + $0xd0] ss:$8 sps:$4 sm:$0xff]  }
  0x4f   :  { %971 = vmatmul.mubr.msk.bf16.vlgmr.msra.gmra.mxu1 %vm167_vm0, %v96_v9  ;;  %672 = vmatpush1.bf16.msra.mxu0 %v1126_v22  ;;  %v1169_v51 = vld [vmem:[#allocation8 + $0xc4] ss:$8 sps:$4 sm:$0xff]   ;;  %v1165_v52 = vld [vmem:[#allocation8 + $0x1f0] ss:$8 sps:$4 sm:$0xff]   ;;  %v1174_v54 = vld [vmem:[#allocation8 + $0xc0] ss:$8 sps:$4 sm:$0xff]  }
  0x50   :  { %709 = vmatpush1.bf16.msra.mxu1 %v1117_v20  ;;  %673 = vmatprep.subr.bf16.mxu0 %v1127_v23  ;;  %v1173_v53 = vld [vmem:[#allocation8 + $0x1e4] ss:$8 sps:$4 sm:$0xff]   ;;  %v1175_v55 = vld [vmem:[#allocation8 + $0xb4] ss:$8 sps:$4 sm:$0xff]   ;;  %v1171_v56 = vld [vmem:[#allocation8 + $0x1e0] ss:$8 sps:$4 sm:$0xff]  }
  0x51   :  { %710 = vmatprep.subr.bf16.mxu1 %v1125_v21  ;;  %v1179_v57 = vld [vmem:[#allocation8 + $0x1d4] ss:$8 sps:$4 sm:$0xff]   ;;  %v1180_v58 = vld [vmem:[#allocation8 + $0xb0] ss:$8 sps:$4 sm:$0xff]   ;;  %v1181_v60 = vld [vmem:[#allocation8 + $0xa4] ss:$8 sps:$4 sm:$0xff]  }
  0x52   :  { %v1177_v59 = vld [vmem:[#allocation8 + $0x1d0] ss:$8 sps:$4 sm:$0xff]   ;;  %v1185_v61 = vld [vmem:[#allocation8 + $0x1c4] ss:$8 sps:$4 sm:$0xff]   ;;  %v1183_v62 = vld [vmem:[#allocation8 + $0x1c0] ss:$8 sps:$4 sm:$0xff]  }
  0x53   :  { %674 = vmatpush1.bf16.msra.mxu0 %v1132_v26  ;;  %v1186_v63 = vld [vmem:[#allocation8 + $0xa0] ss:$8 sps:$4 sm:$0xff]   ;;  %v1187_v0 = vld [vmem:[#allocation8 + $0x94] ss:$8 sps:$4 sm:$0xff]   ;;  %v1189_v2 = vld [vmem:[#allocation8 + $0x1b0] ss:$8 sps:$4 sm:$0xff]  }
  0x54   :  { %711 = vmatpush1.bf16.msra.mxu1 %v1123_v24  ;;  %675 = vmatprep.subr.bf16.mxu0 %v1133_v27  ;;  %v1191_v1 = vld [vmem:[#allocation8 + $0x1b4] ss:$8 sps:$4 sm:$0xff]   ;;  %v1192_v3 = vld [vmem:[#allocation8 + $0x90] ss:$8 sps:$4 sm:$0xff]   ;;  %v1193_v4 = vld [vmem:[#allocation8 + $0x84] ss:$8 sps:$4 sm:$0xff]  }
  0x55   :  { %712 = vmatprep.subr.bf16.mxu1 %v1131_v25  ;;  %v1197_v5 = vld [vmem:[#allocation8 + $0x1a4] ss:$8 sps:$4 sm:$0xff]   ;;  %v1195_v6 = vld [vmem:[#allocation8 + $0x1a0] ss:$8 sps:$4 sm:$0xff]   ;;  %v1201_v8 = vld [vmem:[#allocation8 + $0x194] ss:$8 sps:$4 sm:$0xff]  }
  0x56   :  { %v1198_v7 = vld [vmem:[#allocation8 + $0x80] ss:$8 sps:$4 sm:$0xff]   ;;  %v1199_v9 = vld [vmem:[#allocation8 + $0x190] ss:$8 sps:$4 sm:$0xff]   ;;  %v1204_v10 = vld [vmem:[#allocation8 + $0x184] ss:$8 sps:$4 sm:$0xff]  }
  0x57   :  { %676 = vmatpush1.bf16.msra.mxu0 %v1138_v30  ;;  %v1202_v11 = vld [vmem:[#allocation8 + $0x180] ss:$8 sps:$4 sm:$0xff]   ;;  %v1205_v12 = vld [vmem:[#allocation10 + $0x78] sm:$0xff]   ;;  %v1422_v14 = vshrl.u32 %v107_v13, 7  ;;  %s1321_s9 = scalar_lea.vmem %s949_s8, 128 }
  0x58   :  { %713 = vmatpush1.bf16.msra.mxu1 %v1129_v28  ;;  %677 = vmatprep.subr.bf16.mxu0 %v1139_v31  ;;  %v105_v17 = vld [vmem:[#allocation7] sm:$0xf]  ;;  %p1322_p11 = scmp.ne.s32.totalorder %s949_s8, %s1321_s9  ;;  %p1327_p13 = scmp.lt.s32.totalorder %s1321_s9, %s1321_s9 }
  0x59   :  { %714 = vmatprep.subr.bf16.mxu1 %v1137_v29  ;;  %v113_v15 = vsub.s32 1, %v1422_v14  ;;  %v109_v16 = vsub.s32 0, %v1422_v14  ;;  %v121_v25 = vsub.s32 3, %v1422_v14  ;;  %v117_v28 = vsub.s32 2, %v1422_v14 }
  0x5a   :  { %p1328_p0 = por %p1327_p13, %p1326_p12 }
  0x5b   :  { %678 = vmatpush1.bf16.msra.mxu0 %v1144_v34  ;;  %v114_v19 = vrot.slane %v105_v17, %v113_v15  ;;  %v110_v20 = vrot.slane %v105_v17, %v109_v16  ;;  %v122_v34 = vrot.slane %v105_v17, %v121_v25 }
  0x5c   :  { %715 = vmatpush1.bf16.msra.mxu1 %v1135_v32  ;;  %679 = vmatprep.subr.bf16.mxu0 %v1145_v35  ;;  %p1329_p1 = pnand %p1328_p0, %p1322_p11 }
  0x5d   :  { %716 = vmatprep.subr.bf16.mxu1 %v1143_v33 }
  0x5f   :  { %680 = vmatpush1.bf16.msra.mxu0 %v1150_v38 }
  0x60   :  { %717 = vmatpush1.bf16.msra.mxu1 %v1141_v36  ;;  %681 = vmatprep.subr.bf16.mxu0 %v1151_v39  ;;  %v118_v36 = vrot.slane %v105_v17, %v117_v28  ;;  %v1206_v39 = vld [vmem:[#allocation10 + $0x38] sm:$0xff]  }
  0x61   :  { %718 = vmatprep.subr.bf16.mxu1 %v1149_v37 }
  0x63   :  { %682 = vmatpush2.bf16.msra.mxu0 %v1156_v43 }
  0x64   :  { %719 = vmatpush1.bf16.msra.mxu1 %v1147_v40  ;;  %683 = vmatprep.subr.bf16.mxu0 %v1157_v44 }
  0x65   :  { %720 = vmatprep.subr.bf16.mxu1 %v1155_v41 }
  0x67   :  { %684 = vmatpush2.bf16.msra.mxu0 %v1162_v46 }
  0x68   :  { %721 = vmatpush1.bf16.msra.mxu1 %v1153_v42  ;;  %685 = vmatprep.subr.bf16.mxu0 %v1163_v47  ;;  %v1207_v42 = vld [vmem:[#allocation10 + $0x70] sm:$0xff]  }
  0x69   :  { %722 = vmatprep.subr.bf16.mxu1 %v1161_v45 }
  0x6b   :  { %686 = vmatpush2.bf16.msra.mxu0 %v1168_v50  ;;  %v1209_v50 = vld [vmem:[#allocation10 + $0x68] sm:$0xff]  }
  0x6c   :  { %723 = vmatpush1.bf16.msra.mxu1 %v1159_v48  ;;  %687 = vmatprep.subr.bf16.mxu0 %v1169_v51  ;;  %v1208_v48 = vld [vmem:[#allocation10 + $0x30] sm:$0xff]  }
  0x6d   :  { %724 = vmatprep.subr.bf16.mxu1 %v1167_v49 }
  0x6f   :  { %688 = vmatpush2.bf16.msra.mxu0 %v1174_v54 }
  0x70   :  { %725 = vmatpush2.bf16.msra.mxu1 %v1165_v52  ;;  %689 = vmatprep.subr.bf16.mxu0 %v1175_v55  ;;  %v1210_v55 = vld [vmem:[#allocation10 + $0x28] sm:$0xff]  }
  0x71   :  { %726 = vmatprep.subr.bf16.mxu1 %v1173_v53 }
  0x73   :  { %690 = vmatpush2.bf16.msra.mxu0 %v1180_v58  ;;  %v1212_v58 = vld [vmem:[#allocation10 + $0x20] sm:$0xff]  }
  0x74   :  { %727 = vmatpush2.bf16.msra.mxu1 %v1171_v56  ;;  %691 = vmatprep.subr.bf16.mxu0 %v1181_v60  ;;  %v1214_v60 = vld [vmem:[#allocation10 + $0x18] sm:$0xff]  }
  0x75   :  { %728 = vmatprep.subr.bf16.mxu1 %v1179_v57  ;;  %v1211_v57 = vld [vmem:[#allocation10 + $0x60] sm:$0xff]  }
  0x77   :  { %692 = vmatpush2.bf16.msra.mxu0 %v1186_v63  ;;  %v1217_v63 = vld [vmem:[#allocation10 + $0x48] sm:$0xff]  }
  0x78   :  { %729 = vmatpush2.bf16.msra.mxu1 %v1177_v59  ;;  %693 = vmatprep.subr.bf16.mxu0 %v1187_v0  ;;  %v1213_v59 = vld [vmem:[#allocation10 + $0x58] sm:$0xff]   ;;  %v1218_v0 = vld [vmem:[#allocation10 + $0x8] sm:$0xff]  }
  0x79   :  { %730 = vmatprep.subr.bf16.mxu1 %v1185_v61  ;;  %v1215_v61 = vld [vmem:[#allocation10 + $0x50] sm:$0xff]  }
  0x7b   :  { %694 = vmatpush2.bf16.msra.mxu0 %v1192_v3 }
  0x7c   :  { %731 = vmatpush2.bf16.msra.mxu1 %v1183_v62  ;;  %695 = vmatprep.subr.bf16.mxu0 %v1193_v4  ;;  %v1216_v62 = vld [vmem:[#allocation10 + $0x10] sm:$0xff]  }
  0x7d   :  { %732 = vmatprep.subr.bf16.mxu1 %v1191_v1  ;;  %v1219_v1 = vld [vmem:[#allocation10 + $0x40] sm:$0xff]  }
  0x7f   :  { %696 = vmatpush2.bf16.msra.mxu0 %v1198_v7 }
  0x80   :  { %733 = vmatpush2.bf16.msra.mxu1 %v1189_v2  ;;  %1062 = vmatprep.subr.bf16.mxu0 %v1205_v12  ;;  %v1220_v2 = vld [vmem:[#allocation10] sm:$0xff]  }
  0x81   :  { %734 = vmatprep.subr.bf16.mxu1 %v1197_v5  ;;  %v333_v5 = vld [vmem:[%s1452_s4] sm:$0x3] }
  0x82   :  { %v342_v7 = vrot.slane %v333_v5, %v113_v15 }
  0x84   :  { %735 = vmatpush2.bf16.msra.mxu1 %v1195_v6 }
  0x85   :  { %736 = vmatprep.subr.bf16.mxu1 %v1201_v8  ;;  %v338_v8 = vrot.slane %v333_v5, %v109_v16 }
  0x88   :  { %737 = vmatpush2.bf16.msra.mxu1 %v1199_v9 }
  0x89   :  { %738 = vmatprep.subr.bf16.mxu1 %v1204_v10 }
  0x8c   :  { %739 = vmatpush2.bf16.msra.mxu1 %v1202_v11 }
 0x107   :  { %v205_v18 = vpop.f32.mrf.mxu1 }
 0x108   :  { %v206_v26 = vadd.f32 %v205_v18, %v110_v20 }
 0x109   :  { %v207_v21 = vpop.f32.mrf.mxu1 }
 0x10a   :  { %v208_v23 = vadd.f32 %v207_v21, %v114_v19  ;;  %v257_v35 = vmax.f32 %v206_v26, 0.0 }
 0x10b   :  { %v209_v22 = vpop.f32.mrf.mxu1 }
 0x10c   :  { %v210_v24 = vadd.f32 %v209_v22, %v110_v20  ;;  %v258_v32 = vmax.f32 %v208_v23, 0.0 }
 0x10d   :  { %v211_v27 = vpop.f32.mrf.mxu1 }
 0x10e   :  { %v212_v29 = vadd.f32 %v211_v27, %v114_v19  ;;  %v261_v30 = vmax.f32 %v210_v24, 0.0 }
 0x10f   :  { %v248_v31 = vpop.f32.mrf.mxu1 }
 0x110   :  { %v262_v33 = vmax.f32 %v212_v29, 0.0  ;;  %v265_v40 = vpack.c.bf16 %v261_v30, %v257_v35  ;;  %v249_v45 = vadd.f32 %v248_v31, %v118_v36 }
 0x111   :  { %v250_v37 = vpop.f32.mrf.mxu1 }
 0x112   :  { %v266_v38 = vpack.c.bf16 %v262_v33, %v258_v32  ;;  %v251_v43 = vadd.f32 %v250_v37, %v122_v34  ;;  %v259_v53 = vmax.f32 %v249_v45, 0.0  ;;  %v1036_v32 = vld [vmem:[%s1454_s6] ss:$0 sm:$0xff] }
 0x113   :  { %v252_v41 = vpop.f32.mrf.mxu1 }
 0x114   :  { %v253_v44 = vadd.f32 %v252_v41, %v118_v36  ;;  %697 = vmatprep.mubr.bf16.mxu0 %v266_v38  ;;  %v260_v51 = vmax.f32 %v251_v43, 0.0 }
 0x115   :  { %v254_v46 = vpop.f32.mrf.mxu1  ;;  %698 = vmatmul.mubr.bf16.vlgmr.msra.gmra.mxu0 %v265_v40 }
 0x116   :  { %v255_v47 = vadd.f32 %v254_v46, %v122_v34  ;;  %1063 = vmatpush3.bf16.msra.mxu0 %v1206_v39  ;;  %v263_v49 = vmax.f32 %v253_v44, 0.0 }
 0x117   :  { %1064 = vmatprep.subr.bf16.mxu0 %v1207_v42 }
 0x118   :  { %v264_v52 = vmax.f32 %v255_v47, 0.0  ;;  %v267_v56 = vpack.c.bf16 %v263_v49, %v259_v53 }
 0x11a   :  { %v268_v54 = vpack.c.bf16 %v264_v52, %v260_v51  ;;  %1065 = vmatpush3.bf16.msra.mxu0 %v1208_v48 }
 0x11b   :  { %1066 = vmatprep.subr.bf16.mxu0 %v1209_v50 }
 0x11c   :  { %740 = vmatprep.mubr.bf16.mxu1 %v268_v54 }
 0x11d   :  { %741 = vmatmul.mubr.bf16.vlgmr.msra.gmra.mxu1 %v267_v56 }
 0x11e   :  { %1067 = vmatpush3.bf16.msra.mxu0 %v1210_v55 }
 0x11f   :  { %1068 = vmatprep.subr.bf16.mxu0 %v1211_v57 }
 0x122   :  { %1069 = vmatpush3.bf16.msra.mxu0 %v1212_v58 }
 0x123   :  { %1070 = vmatprep.subr.bf16.mxu0 %v1213_v59 }
 0x126   :  { %1071 = vmatpush3.bf16.msra.mxu0 %v1214_v60 }
 0x127   :  { %1072 = vmatprep.subr.bf16.mxu0 %v1215_v61 }
 0x12a   :  { %1073 = vmatpush3.bf16.msra.mxu0 %v1216_v62 }
 0x12b   :  { %1074 = vmatprep.subr.bf16.mxu0 %v1217_v63 }
 0x12e   :  { %1075 = vmatpush3.bf16.msra.mxu0 %v1218_v0 }
 0x12f   :  { %1076 = vmatprep.subr.bf16.mxu0 %v1219_v1 }
 0x132   :  { %1077 = vmatpush3.bf16.msra.mxu0 %v1220_v2 }
 0x1d5   :  { %v699_v3 = vpop.f32.mrf.mxu0 }
 0x1d6   :  { %v700_v17 = vadd.f32 %v699_v3, %v338_v8 }
 0x1d7   :  { %v701_v4 = vpop.f32.mrf.mxu0 }
 0x1d8   :  { %v702_v12 = vadd.f32 %v701_v4, %v342_v7 }
 0x1d9   :  { %v703_v6 = vpop.f32.mrf.mxu0 }
 0x1da   :  { %v704_v13 = vadd.f32 %v703_v6, %v338_v8 }
 0x1db   :  { %v705_v10 = vpop.f32.mrf.mxu0 }
 0x1dc   :  { %v706_v19 = vadd.f32 %v705_v10, %v342_v7 }
 0x1dd   :  { %v742_v9 = vpop.f32.mrf.mxu1 }
 0x1de   :  { %v743_v22 = vadd.f32 %v742_v9, %v700_v17 }
 0x1df   :  { %v744_v11 = vpop.f32.mrf.mxu1 }
 0x1e0   :  { %v745_v20 = vadd.f32 %v744_v11, %v702_v12  ;;  %v751_v15 = vmax.f32 %v743_v22, 0.0 }
 0x1e1   :  { %v746_v18 = vpop.f32.mrf.mxu1 }
 0x1e2   :  { %v747_v21 = vadd.f32 %v746_v18, %v704_v13  ;;  %v752_v26 = vmax.f32 %v745_v20, 0.0 }
 0x1e3   :  { %v748_v23 = vpop.f32.mrf.mxu1 }
 0x1e4   :  { %v749_v24 = vadd.f32 %v748_v23, %v706_v19  ;;  %v753_v25 = vmax.f32 %v747_v21, 0.0 }
 0x1e6   :  { %v754_v27 = vmax.f32 %v749_v24, 0.0  ;;  %v755_v14 = vpack.c.bf16 %v753_v25, %v751_v15 }
 0x1e8   :  { %v756_v28 = vpack.c.bf16 %v754_v27, %v752_v26 }
 0x1ea   :  { %924 = vmatprep.mubr.bf16.mxu0 %v756_v28 }
 0x1eb   :  { %925 = vmatmul.mubr.bf16.vlgmr.msra.gmra.mxu0 %v755_v14 }
 0x2ab   :  { %v1078_v16 = vpop.f32.mrf.mxu0 }
 0x2ad   :  { %v1079_v29 = vpop.f32.mrf.mxu0 }
 0x2ae   :  { %v1080_v31 = vadd.f32 %v1079_v29, %v1078_v16 }
 0x2af   :  { %v1081_v30 = vpop.f32.mrf.mxu0 }
 0x2b0   :  { %v927_v35 = vadd.f32 %v1080_v31, %v1036_v32 }
 0x2b1   :  { %v1082_v33 = vpop.f32.mrf.mxu0 }
 0x2b2   :  { %v1083_v34 = vadd.f32 %v1082_v33, %v1081_v30 }
 0x2b4   :  { %v930_v36 = vadd.f32 %v1083_v34, %v1036_v32 }
 0x2b6   :  { %v1060_v37 = vpack.c.bf16 %v930_v36, %v927_v35 }
 0x2b8   :  { %1061 = vst [vmem:[#allocation11] sm:$0xff] %v1060_v37  }
 0x2b9   :  { %1332 = shalt.err (!%p1329_p1)
}
 0x2ba   :  { %954 = dma.vmem_to_hbm [thread:$0]  %s949_s8, 128, %s1455_s7, [#allocation4], %s1358_s0, %s1358_s0, %s1359_s26  }
 0x2bb   :  { %1347 = dma.done.wait [#allocation4], 128  }
 0x2bc   :  { %1348 = vsyncadd [#allocation4], 4294967168 }
 0x2bd   :  { %958 = vsyncpa [#allocation3], 1 }
 0x2be   :  { %959 = vsyncpa [#allocation6], 1 }
 0x2bf   :  { %960 = vsyncpa [#allocation9], 1 }
 0x2c0   :  { %961 = vsyncpa [#allocation4], 1 }

</bundles_post_ra>
